<compile_context>
chip_gen: v7x
topology: tpu7x:2x2x1
jax: 0.10.0
libtpu: 0.0.40
codegen_flags: <defaults>
</compile_context>

<pallas_src>
import functools

import jax
import jax.numpy as jnp
from jax.experimental import pallas as pl
from jax.experimental.pallas import tpu as pltpu


# ---------------------------------------------------------------------------
# Kernels
# ---------------------------------------------------------------------------

def _ca_single_kernel(x_ref, w1t_ref, b1_ref, w2t_ref, b2_ref, o_ref):
    """Whole (TN, C, HW) slab per grid step: pool + MLP + rescale fused."""
    x = x_ref[...]                                   # (TN, C, HW)
    inv_hw = 1.0 / x.shape[-1]

    # Global average pool over the spatial (lane) axis -> (TN, C), f32 accum.
    pooled = jnp.sum(x.astype(jnp.float32), axis=-1) * inv_hw

    # 1x1 conv #1: (TN, C) @ (C, Cr) + b1 -> ReLU.
    h = jnp.dot(pooled, w1t_ref[...], preferred_element_type=jnp.float32)
    h = jnp.maximum(h + b1_ref[...], 0.0)            # (TN, Cr)

    # 1x1 conv #2: (TN, Cr) @ (Cr, C) + b2 -> Sigmoid.
    y = jnp.dot(h, w2t_ref[...], preferred_element_type=jnp.float32)
    y = jax.nn.sigmoid(y + b2_ref[...])              # (TN, C)

    # Channel-wise rescale broadcast over spatial; lane-dense store.
    o_ref[...] = (x.astype(jnp.float32) * y[:, :, None]).astype(o_ref.dtype)


def _pool_kernel(x_ref, o_ref, *, inv_hw):
    """Phase 1: accumulate spatial sums of a (TN, C, THW) tile into (TN, C, 1)."""
    h = pl.program_id(1)

    @pl.when(h == 0)
    def _():
        o_ref[...] = jnp.zeros_like(o_ref)

    o_ref[...] += jnp.sum(x_ref[...].astype(jnp.float32), axis=-1, keepdims=True)

    @pl.when(h == pl.num_programs(1) - 1)
    def _():
        o_ref[...] = o_ref[...] * inv_hw


def _rescale_kernel(x_ref, y_ref, o_ref):
    """Phase 2: o = x * y, y is (TN, C, 1) so the multiply is a VPU broadcast."""
    o_ref[...] = (x_ref[...].astype(jnp.float32) * y_ref[...]).astype(o_ref.dtype)


# ---------------------------------------------------------------------------
# Generation-aware VMEM planning / tiling
# ---------------------------------------------------------------------------

def _vmem_plan():
    """Returns (block_budget_bytes, vmem_limit_cap_bytes, prefer_core_split)."""
    cap = None
    try:
        cap = int(getattr(pltpu.get_tpu_info(), "vmem_capacity_bytes", 0)) or None
    except Exception:
        cap = None
    if cap is not None and cap > (80 << 20):
        # v5e / v6e: 128 MiB VMEM per TensorCore -> take big blocks.
        return (96 << 20), (108 << 20), False
    # v7x (64 MiB/TC, 2 TCs) or unknown: conservative, keep >=16 MiB headroom.
    prefer_split = cap is not None
    return (36 << 20), (48 << 20), prefer_split


def _choose_batch_tile(N, C, HW, itemsize, block_budget, prefer_split):
    """Largest divisor of N whose double-buffered x+out blocks fit the budget."""
    tn = 1
    for cand in range(1, N + 1):
        if N % cand == 0 and 4 * cand * C * HW * itemsize <= block_budget:
            tn = cand
    if prefer_split and N > 1 and N // tn < 2:
        # v7x only: 'parallel' grid axis is sharded across the 2 TensorCores,
        # so prefer an even number of grid steps; keep blocks >= 1 MiB if we can.
        for floor_bytes in (1 << 20, 0):
            found = False
            for cand in range(tn - 1, 0, -1):
                steps = N // cand
                if (N % cand == 0 and steps >= 2 and steps % 2 == 0
                        and cand * C * HW * itemsize >= floor_bytes):
                    tn = cand
                    found = True
                    break
            if found:
                break
    return tn


def _choose_hw_tile(HW, C, itemsize, block_budget):
    """Largest 128-multiple divisor of HW whose (1,C,thw) x+out blocks fit."""
    best = None
    for d in range(128, HW + 1, 128):
        if HW % d == 0 and 4 * C * d * itemsize <= block_budget:
            best = d
    if best is None:
        # Smallest 128-multiple divisor (lane-dense) even if it overshoots the
        # budget slightly; the vmem_limit still gets the explicit headroom.
        for d in range(128, HW + 1, 128):
            if HW % d == 0:
                best = d
                break
    if best is None:
        # TODO(synk): HW with no 128-multiple divisor falls back to a single
        # (masked-store) tile; a cdiv grid with boundary masking would fix it.
        best = HW
    return best


# ---------------------------------------------------------------------------
# Wrappers
# ---------------------------------------------------------------------------

def _ca_single_phase(x, w1, b1, w2, b2, block_budget, limit_cap, prefer_split):
    N, C, HW = x.shape
    Cr = w1.shape[0]
    itemsize = x.dtype.itemsize

    tn = _choose_batch_tile(N, C, HW, itemsize, block_budget, prefer_split)
    grid = (N // tn,)

    # Lane-major parameter layouts: no in-kernel transposes, biases as rows.
    w1t = w1.T                    # (C, Cr)
    w2t = w2.T                    # (Cr, C)
    b1r = b1.reshape(1, Cr)
    b2r = b2.reshape(1, C)

    block_bytes = tn * C * HW * itemsize
    param_bytes = 2 * 4 * (w1t.size + w2t.size + b1r.size + b2r.size)
    vmem_need = 4 * block_bytes + param_bytes + (4 << 20)   # (8,128) padding + scratch headroom
    vmem_limit = int(min(max(vmem_need, 32 << 20), limit_cap))

    return pl.pallas_call(
        _ca_single_kernel,
        out_shape=jax.ShapeDtypeStruct((N, C, HW), x.dtype),
        grid_spec=pltpu.PrefetchScalarGridSpec(
            num_scalar_prefetch=0,
            grid=grid,
            in_specs=[
                pl.BlockSpec((tn, C, HW), lambda n: (n, 0, 0)),
                pl.BlockSpec((C, Cr), lambda n: (0, 0)),
                pl.BlockSpec((1, Cr), lambda n: (0, 0)),
                pl.BlockSpec((Cr, C), lambda n: (0, 0)),
                pl.BlockSpec((1, C), lambda n: (0, 0)),
            ],
            out_specs=pl.BlockSpec((tn, C, HW), lambda n: (n, 0, 0)),
        ),
        compiler_params=pltpu.CompilerParams(
            dimension_semantics=("parallel",),
            vmem_limit_bytes=vmem_limit,
        ),
    )(x, w1t, b1r, w2t, b2r)


def _ca_two_phase(x, w1, b1, w2, b2, block_budget, limit_cap):
    N, C, HW = x.shape
    Cr = w1.shape[0]
    itemsize = x.dtype.itemsize

    thw = _choose_hw_tile(HW, C, itemsize, block_budget)
    tn = 1
    for cand in range(1, N + 1):
        if N % cand == 0 and 4 * cand * C * thw * itemsize <= block_budget:
            tn = cand

    block_bytes = tn * C * thw * itemsize
    vmem_need = 4 * block_bytes + 4 * tn * C * 4 + (4 << 20)
    vmem_limit = int(min(max(vmem_need, 32 << 20), limit_cap))
    grid = (N // tn, HW // thw)

    # Phase 1: HW-tiled global average pool -> (N, C, 1) in f32.
    pooled = pl.pallas_call(
        functools.partial(_pool_kernel, inv_hw=1.0 / HW),
        out_shape=jax.ShapeDtypeStruct((N, C, 1), jnp.float32),
        grid_spec=pltpu.PrefetchScalarGridSpec(
            num_scalar_prefetch=0,
            grid=grid,
            in_specs=[pl.BlockSpec((tn, C, thw), lambda n, h: (n, 0, h))],
            out_specs=pl.BlockSpec((tn, C, 1), lambda n, h: (n, 0, 0)),
        ),
        compiler_params=pltpu.CompilerParams(
            dimension_semantics=("parallel", "arbitrary"),
            vmem_limit_bytes=vmem_limit,
        ),
    )(x)

    # Tiny C -> Cr -> C MLP in plain JAX (compute is irrelevant at this size).
    p = pooled[:, :, 0]                                       # (N, C)
    hmid = jnp.maximum(p @ w1.T + b1.reshape(1, Cr), 0.0)     # (N, Cr)
    yscale = jax.nn.sigmoid(hmid @ w2.T + b2.reshape(1, C))   # (N, C)
    y3 = yscale[:, :, None].astype(jnp.float32)               # (N, C, 1)

    # Phase 2: HW-tiled rescale, lane-dense output stores.
    return pl.pallas_call(
        _rescale_kernel,
        out_shape=jax.ShapeDtypeStruct((N, C, HW), x.dtype),
        grid_spec=pltpu.PrefetchScalarGridSpec(
            num_scalar_prefetch=0,
            grid=grid,
            in_specs=[
                pl.BlockSpec((tn, C, thw), lambda n, h: (n, 0, h)),
                pl.BlockSpec((tn, C, 1), lambda n, h: (n, 0, 0)),
            ],
            out_specs=pl.BlockSpec((tn, C, thw), lambda n, h: (n, 0, h)),
        ),
        compiler_params=pltpu.CompilerParams(
            dimension_semantics=("parallel", "parallel"),
            vmem_limit_bytes=vmem_limit,
        ),
    )(x, y3)


def ca_layer(x_nchw, w1, b1, w2, b2, *, force_two_phase=False,
             block_budget_override=None):
    """CALayer forward.

    x_nchw: (N, C, H, W)
    w1: (Cr, C), b1: (Cr, 1)  -- first 1x1 conv
    w2: (C, Cr), b2: (C, 1)   -- second 1x1 conv
    """
    N, C, H, W = x_nchw.shape
    HW = H * W
    x = x_nchw.reshape(N, C, HW)
    itemsize = x.dtype.itemsize

    block_budget, limit_cap, prefer_split = _vmem_plan()
    if block_budget_override is not None:
        block_budget = int(block_budget_override)

    # Single-phase only if even a per-sample (1, C, HW) slab (double-buffered
    # x + out) fits the block budget; otherwise stream HW in two phases.
    if not force_two_phase and 4 * C * HW * itemsize <= block_budget:
        out = _ca_single_phase(x, w1, b1, w2, b2, block_budget, limit_cap,
                               prefer_split)
    else:
        out = _ca_two_phase(x, w1, b1, w2, b2, block_budget, limit_cap)

    return out.reshape(N, C, H, W)


# ---------------------------------------------------------------------------
# Reference + test
# ---------------------------------------------------------------------------

def _reference(x, w1, b1, w2, b2):
    pooled = jnp.mean(x, axis=(2, 3))                         # (N, C)
    h = jnp.maximum(pooled @ w1.T + b1[:, 0], 0.0)            # (N, Cr)
    y = jax.nn.sigmoid(h @ w2.T + b2[:, 0])                   # (N, C)
    return x * y[:, :, None, None]


if __name__ == "__main__":
    N, C, H, W = 2, 32, 16, 16
    reduction = 4
    Cr = C // reduction

    key = jax.random.PRNGKey(0)
    k_x, k_w1, k_b1, k_w2, k_b2 = jax.random.split(key, 5)

    x = jax.random.normal(k_x, (N, C, H, W), dtype=jnp.float32)
    # Parameter shapes match nn.Conv2d(C, Cr, 1) / nn.Conv2d(Cr, C, 1).
    w1 = jax.random.normal(k_w1, (Cr, C), dtype=jnp.float32) * 0.1
    b1 = jax.random.normal(k_b1, (Cr, 1), dtype=jnp.float32) * 0.1
    w2 = jax.random.normal(k_w2, (C, Cr), dtype=jnp.float32) * 0.1
    b2 = jax.random.normal(k_b2, (C, 1), dtype=jnp.float32) * 0.1

    ref = _reference(x, w1, b1, w2, b2)

    # Path 1: fused single-phase kernel (whole feature map per block).
    out1 = jax.block_until_ready(ca_layer(x, w1, b1, w2, b2))
    assert jnp.allclose(out1, ref, atol=1e-4, rtol=1e-4), "single-phase mismatch"

    # Path 2: two-phase HW-tiled fallback, forced with a tiny block budget so
    # the grid actually tiles HW (thw=128) at this small shape.
    out2 = jax.block_until_ready(
        ca_layer(x, w1, b1, w2, b2, force_two_phase=True,
                 block_budget_override=64 * 1024))
    assert jnp.allclose(out2, ref, atol=1e-4, rtol=1e-4), "two-phase mismatch"

    print("KERNEL_OK")
</pallas_src>

<mosaic_0001>
module attributes {stable_mosaic.version = 11 : i64} {
  func.func @_ca_single_kernel(%arg0: i32, %arg1: memref<2x32x256xf32, #tpu.memory_space<vmem>>, %arg2: memref<32x8xf32, #tpu.memory_space<vmem>>, %arg3: memref<1x8xf32, #tpu.memory_space<vmem>>, %arg4: memref<8x32xf32, #tpu.memory_space<vmem>>, %arg5: memref<1x32xf32, #tpu.memory_space<vmem>>, %arg6: memref<2x32x256xf32, #tpu.memory_space<vmem>>) attributes {dimension_semantics = [#tpu.dimension_semantics<parallel>], iteration_bounds = array<i64: 1>, scalar_prefetch = 0 : i64, scratch_operands = 0 : i64, tpu.core_type = #tpu.core_type<tc>, window_params = [{transform_indices = @transform_0, window_bounds = array<i64: 2, 32, 256>}, {pipeline_mode = #tpu.pipeline_mode<synchronous>, transform_indices = @transform_1, window_bounds = array<i64: 32, 8>}, {pipeline_mode = #tpu.pipeline_mode<synchronous>, transform_indices = @transform_2, window_bounds = array<i64: 1, 8>}, {pipeline_mode = #tpu.pipeline_mode<synchronous>, transform_indices = @transform_3, window_bounds = array<i64: 8, 32>}, {pipeline_mode = #tpu.pipeline_mode<synchronous>, transform_indices = @transform_4, window_bounds = array<i64: 1, 32>}, {transform_indices = @transform_5, window_bounds = array<i64: 2, 32, 256>}]} {
    %c0 = arith.constant 0 : index
    %c0_0 = arith.constant 0 : index
    %c0_1 = arith.constant 0 : index
    %0 = vector.load %arg1[%c0, %c0_0, %c0_1] : memref<2x32x256xf32, #tpu.memory_space<vmem>>, vector<2x32x256xf32>
    %cst = arith.constant dense<0.000000e+00> : vector<2x32xf32>
    %1 = vector.multi_reduction <add>, %0, %cst [2] : vector<2x32x256xf32> to vector<2x32xf32>
    %cst_2 = arith.constant 3.906250e-03 : f32
    %2 = vector.broadcast %cst_2 : f32 to vector<2x32xf32>
    %3 = arith.mulf %1, %2 : vector<2x32xf32>
    %c0_3 = arith.constant 0 : index
    %c0_4 = arith.constant 0 : index
    %4 = vector.load %arg2[%c0_3, %c0_4] : memref<32x8xf32, #tpu.memory_space<vmem>>, vector<32x8xf32>
    %cst_5 = arith.constant dense<0.000000e+00> : vector<2x8xf32>
    %5 = tpu.matmul %3, %4, %cst_5 {dimension_numbers = #tpu.dot_dimension_numbers<[1], [0], [0], [1], [0, 0, 1, 1], [], []>} : vector<2x32xf32>, vector<32x8xf32>, vector<2x8xf32> -> vector<2x8xf32>
    %c0_6 = arith.constant 0 : index
    %c0_7 = arith.constant 0 : index
    %6 = vector.load %arg3[%c0_6, %c0_7] : memref<1x8xf32, #tpu.memory_space<vmem>>, vector<1x8xf32>
    %7 = vector.broadcast %6 : vector<1x8xf32> to vector<2x8xf32>
    %8 = arith.addf %5, %7 : vector<2x8xf32>
    %cst_8 = arith.constant 0.000000e+00 : f32
    %9 = vector.broadcast %cst_8 : f32 to vector<2x8xf32>
    %10 = arith.maximumf %8, %9 : vector<2x8xf32>
    %c0_9 = arith.constant 0 : index
    %c0_10 = arith.constant 0 : index
    %11 = vector.load %arg4[%c0_9, %c0_10] : memref<8x32xf32, #tpu.memory_space<vmem>>, vector<8x32xf32>
    %cst_11 = arith.constant dense<0.000000e+00> : vector<2x32xf32>
    %12 = tpu.matmul %10, %11, %cst_11 {dimension_numbers = #tpu.dot_dimension_numbers<[1], [0], [0], [1], [0, 0, 1, 1], [], []>} : vector<2x8xf32>, vector<8x32xf32>, vector<2x32xf32> -> vector<2x32xf32>
    %c0_12 = arith.constant 0 : index
    %c0_13 = arith.constant 0 : index
    %13 = vector.load %arg5[%c0_12, %c0_13] : memref<1x32xf32, #tpu.memory_space<vmem>>, vector<1x32xf32>
    %14 = vector.broadcast %13 : vector<1x32xf32> to vector<2x32xf32>
    %15 = arith.addf %12, %14 : vector<2x32xf32>
    %16 = arith.negf %15 : vector<2x32xf32>
    %17 = math.exp %16 : vector<2x32xf32>
    %cst_14 = arith.constant 1.000000e+00 : f32
    %18 = vector.broadcast %cst_14 : f32 to vector<2x32xf32>
    %19 = arith.addf %18, %17 : vector<2x32xf32>
    %20 = arith.divf %18, %19 : vector<2x32xf32>
    %21 = vector.shape_cast %20 : vector<2x32xf32> to vector<2x32x1xf32>
    %22 = vector.broadcast %21 : vector<2x32x1xf32> to vector<2x32x256xf32>
    %23 = arith.mulf %0, %22 : vector<2x32x256xf32>
    %c0_15 = arith.constant 0 : index
    %c0_16 = arith.constant 0 : index
    %c0_17 = arith.constant 0 : index
    %24 = vector.load %arg6[%c0_15, %c0_16, %c0_17] : memref<2x32x256xf32, #tpu.memory_space<vmem>>, vector<2x32x256xf32>
    tpu.vector_store %arg6[%c0_15, %c0_16, %c0_17], %23 {strides = array<i32>} : memref<2x32x256xf32, #tpu.memory_space<vmem>>, vector<2x32x256xf32>,
    return
  }
  func.func @transform_0(%arg0: i32) -> (i32, i32, i32) {
    %c0_i32 = arith.constant 0 : i32
    %c0_i32_0 = arith.constant 0 : i32
    %c0_i32_1 = arith.constant 0 : i32
    return %arg0, %c0_i32, %c0_i32_0 : i32, i32, i32
  }
  func.func @transform_1(%arg0: i32) -> (i32, i32) {
    %c0_i32 = arith.constant 0 : i32
    %c0_i32_0 = arith.constant 0 : i32
    %c0_i32_1 = arith.constant 0 : i32
    return %c0_i32, %c0_i32_0 : i32, i32
  }
  func.func @transform_2(%arg0: i32) -> (i32, i32) {
    %c0_i32 = arith.constant 0 : i32
    %c0_i32_0 = arith.constant 0 : i32
    %c0_i32_1 = arith.constant 0 : i32
    return %c0_i32, %c0_i32_0 : i32, i32
  }
  func.func @transform_3(%arg0: i32) -> (i32, i32) {
    %c0_i32 = arith.constant 0 : i32
    %c0_i32_0 = arith.constant 0 : i32
    %c0_i32_1 = arith.constant 0 : i32
    return %c0_i32, %c0_i32_0 : i32, i32
  }
  func.func @transform_4(%arg0: i32) -> (i32, i32) {
    %c0_i32 = arith.constant 0 : i32
    %c0_i32_0 = arith.constant 0 : i32
    %c0_i32_1 = arith.constant 0 : i32
    return %c0_i32, %c0_i32_0 : i32, i32
  }
  func.func @transform_5(%arg0: i32) -> (i32, i32, i32) {
    %c0_i32 = arith.constant 0 : i32
    %c0_i32_0 = arith.constant 0 : i32
    %c0_i32_1 = arith.constant 0 : i32
    return %arg0, %c0_i32, %c0_i32_0 : i32, i32, i32
  }
}

</mosaic_0001>

<bundles_post_ra>
// kernel: tpu_custom_call.1
= control target key start
LH: loop header
LB: loop body
LE: loop exit
PB: predicated region body
PF: predicated region fallthrough
CT: control target
= control target key end

     0   :  { %10 = vsyncpa [#allocation3], 0  ;;  %s652_s0 = inlined_call_operand.hbm [shape: f32[2,32,256], index: 0, kind: input, shape index: {}]   ;;  %s653_s1 = inlined_call_operand.vmem [shape: f32[32,8], index: 1, kind: input, shape index: {}]   ;;  %s654_s2 = inlined_call_operand.vmem [shape: f32[1,8], index: 2, kind: input, shape index: {}]   ;;  %s655_s3 = inlined_call_operand.vmem [shape: f32[8,32], index: 3, kind: input, shape index: {}]   ;;  %s656_s4 = inlined_call_operand.vmem [shape: f32[1,32], index: 4, kind: input, shape index: {}]   ;;  %s657_s5 = inlined_call_operand.hbm [shape: f32[2,32,256], index: 5, kind: output, shape index: {}]  }
   0x1   :  { %11 = vsyncpa [#allocation4], 0  ;;  %s492_s18 = smov [#allocation2]   ;;  %s444_s22 = scalar_lea.hbm %s652_s0, 2048 }
   0x2   :  { %s17_s19 = sshll.u32 %s492_s18, 4  ;;  %p445_p0 = scmp.ne.s32.totalorder %s652_s0, %s444_s22  ;;  %s18_s19 = int_to_ptr.vmem [resolvable:$true] %s17_s19 }
   0x3   :  { %p448_p1 = scmp.lt.u32.totalorder %s444_s22, %s652_s0 }
   0x5   :  { %p450_p2 = pnand %p448_p1, %p445_p0 }
   0x7   :  { %453 = shalt.err (!%p450_p2)
}
   0x8   :  { %s454_s27 = scalar_lea.vmem %s18_s19, 2048  ;;  %p459_p4 = scmp.lt.s32.totalorder %s18_s19, %s18_s19 }
   0x9   :  { %p455_p3 = scmp.ne.s32.totalorder %s18_s19, %s454_s27  ;;  %p460_p5 = scmp.lt.s32.totalorder %s454_s27, %s454_s27 }
   0xb   :  { %p461_p6 = por %p460_p5, %p459_p4 }
   0xd   :  { %p462_p7 = pnand %p461_p6, %p455_p3 }
   0xf   :  { %465 = shalt.err (!%p462_p7)
}
  0x10   :  { %s493_s28 = smov 256   ;;  %s494_s29 = smov 16  }
  0x11   :  { %23 = dma.hbm_to_vmem [thread:$0]  %s652_s0, 2048, %s18_s19, [#allocation3], %s493_s28, %s493_s28, %s494_s29  }
  0x12   :  { %488 = dma.done.wait [#allocation3], 2048  }
  0x13   :  { %489 = vsyncadd [#allocation3], 4294965248  ;;  %v544_v0 = vld [vmem:[#allocation2 + $0x40] sm:$0xff]  ;;  %v546_v1 = vld [vmem:[#allocation2 + $0x48] sm:$0xff]  ;;  %v495_v27 = vmov 0.0|0.0   ;;  %vm496_vm0 = vmmov 0   ;;  %v102_v32 = vlaneseq }
  0x14   :  { %v548_v2 = vld [vmem:[#allocation2] sm:$0xff]  ;;  %v63_v3 = vadd.f32 %v546_v1, %v544_v0  ;;  %v552_v4 = vld [vmem:[#allocation2 + $0x8] sm:$0xff]  ;;  %v554_v5 = vld [vmem:[#allocation2 + $0x50] sm:$0xff]  ;;  %427 = vmatprep.subr.bf16.mxu0 %v495_v27  ;;  %v497_v31 = vmov 0.0   ;;  %vm113_vm1 = vcmask 130112   ;;  %vm120_vm2 = vcmask 195712  }
  0x15   :  { %v556_v6 = vld [vmem:[#allocation2 + $0x58] sm:$0xff]  ;;  %v51_v7 = vadd.f32 %v552_v4, %v548_v2  ;;  %v560_v8 = vld [vmem:[#allocation2 + $0x10] sm:$0xff]  ;;  %v568_v12 = vld [vmem:[#allocation2 + $0x60] sm:$0xff]  ;;  %419 = vmatprep.mubr.msk.f32.mxu0 %vm496_vm0, %v497_v31  ;;  %422 = vmatprep.subr.mxu1 %v497_v31  ;;  %v103_v34 = vand.u32 127, %v102_v32  ;;  %v604_v39 = vshrl.u32 %v102_v32, 7  ;;  %vm127_vm3 = vcmask 261312  }
  0x16   :  { %v562_v9 = vld [vmem:[#allocation2 + $0x18] sm:$0xff]  ;;  %64 = vadd.xlane.f32.xlu1 %v63_v3  ;;  %v66_v10 = vadd.f32 %v556_v6, %v554_v5  ;;  %v570_v13 = vld [vmem:[#allocation2 + $0x68] sm:$0xff]  ;;  %v572_v14 = vld [vmem:[#allocation2 + $0x20] sm:$0xff]  ;;  %424 = vmatprep.mubr.msk.f32.mxu1 %vm496_vm0, %v497_v31  ;;  %vm148_vm4 = vcmask 1041409   ;;  %vm150_vm5 = vcmask 261120   ;;  %vm232_vm6 = vcmask 64512  }
  0x17   :  { %52 = vadd.xlane.f32.xlu0 %v51_v7  ;;  %v54_v11 = vadd.f32 %v562_v9, %v560_v8  ;;  %v574_v15 = vld [vmem:[#allocation2 + $0x28] sm:$0xff]  ;;  %v69_v16 = vadd.f32 %v570_v13, %v568_v12  ;;  %v580_v18 = vld [vmem:[#allocation2 + $0x70] sm:$0xff]  ;;  %v582_v19 = vld [vmem:[#allocation2 + $0x78] sm:$0xff]  ;;  %v108_v36 = vadd.s32 4294967288, %v103_v34  ;;  %v115_v38 = vadd.s32 4294967280, %v103_v34 }
  0x18   :  { %v57_v17 = vadd.f32 %v574_v15, %v572_v14  ;;  %v584_v20 = vld [vmem:[#allocation2 + $0x30] sm:$0xff]  ;;  %v586_v21 = vld [vmem:[#allocation2 + $0x38] sm:$0xff]  ;;  %v72_v22 = vadd.f32 %v582_v19, %v580_v18  ;;  %v83_v24 = vld [vmem:[%s653_s1] sm:$0xff]  ;;  %v122_v43 = vadd.s32 4294967272, %v103_v34  ;;  %v106_v47 = vsub.s32 %v103_v34, %v604_v39 }
  0x19   :  { %v60_v23 = vadd.f32 %v586_v21, %v584_v20  ;;  %v84_v25 = vld [vmem:[%s653_s1 + $0x8] sm:$0xff]  ;;  %v85_v28 = vld [vmem:[%s653_s1 + $0x10] sm:$0xff]  ;;  %v86_v29 = vld [vmem:[%s653_s1 + $0x18] sm:$0xff]  ;;  %v111_v41 = vsub.s32 %v108_v36, %v604_v39  ;;  %v118_v45 = vsub.s32 %v115_v38, %v604_v39  ;;  %v314_v38 = vsub.s32 0, %v604_v39 }
  0x1a   :  { %67 = vadd.xlane.f32.xlu1 %v66_v10  ;;  %v428_v26 = vpack.c.bf16 %v84_v25, %v83_v24  ;;  %v431_v30 = vpack.c.bf16 %v86_v29, %v85_v28  ;;  %v125_v54 = vsub.s32 %v122_v43, %v604_v39  ;;  %v224_v25 = vld [vmem:[%s655_s3] sm:$0xff] }
  0x1b   :  { %55 = vadd.xlane.f32.xlu0 %v54_v11  ;;  %423 = vmatpush3.msra.mxu1 %v224_v25  ;;  %v401_v31 = vld [vmem:[%s656_s4] ss:$0 sm:$0xff] }
  0x1c   :  { %429 = vmatpush3.bf16.msra.mxu0 %v428_v26  ;;  %v399_v26 = vld [vmem:[%s654_s2] ss:$0 sm:$0xff]  ;;  %s498_s2 = smov [#allocation5]  }
  0x1d   :  { %430 = vmatprep.subr.bf16.mxu0 %v495_v27  ;;  %s387_s3 = sshll.u32 %s498_s2, 4  ;;  %s388_s3 = int_to_ptr.vmem [resolvable:$true] %s387_s3 }
  0x1e   :  { %70 = vadd.xlane.f32.xlu1 %v69_v16  ;;  %s466_s4 = scalar_lea.vmem %s388_s3, 2048  ;;  %p471_p9 = scmp.lt.s32.totalorder %s388_s3, %s388_s3 }
  0x1f   :  { %58 = vadd.xlane.f32.xlu0 %v57_v17  ;;  %p467_p8 = scmp.ne.s32.totalorder %s388_s3, %s466_s4  ;;  %p472_p10 = scmp.lt.s32.totalorder %s466_s4, %s466_s4 }
  0x20   :  { %432 = vmatpush3.bf16.msra.mxu0 %v431_v30 }
  0x21   :  { %p473_p11 = por %p472_p10, %p471_p9 }
  0x22   :  { %73 = vadd.xlane.f32.xlu1 %v72_v22 }
  0x23   :  { %61 = vadd.xlane.f32.xlu0 %v60_v23  ;;  %p474_p12 = pnand %p473_p11, %p467_p8 }
  0xa3   :  { %v65_v33 = vpop.xlane.xlu1 %64 }
  0xa4   :  { %v53_v35 = vpop.xlane.xlu0 %52  ;;  %v79_v48 = vmul.f32 0.00390625, %v65_v33 }
  0xa5   :  { %v75_v51 = vmul.f32 0.00390625, %v53_v35 }
  0xa6   :  { %v132_v58 = vrot.slane %v79_v48, %v106_v47 }
  0xa7   :  { %v68_v37 = vpop.xlane.xlu1 %67  ;;  %v107_v62 = vrot.slane %v75_v51, %v106_v47 }
  0xa8   :  { %v56_v40 = vpop.xlane.xlu0 %55  ;;  %v80_v42 = vmul.f32 0.00390625, %v68_v37 }
  0xa9   :  { %v76_v44 = vmul.f32 0.00390625, %v56_v40 }
  0xaa   :  { %v136_v53 = vrot.slane %v80_v42, %v111_v41  ;;  %v333_v42 = vsub.s32 1, %v604_v39 }
  0xab   :  { %v71_v46 = vpop.xlane.xlu1 %70  ;;  %v112_v55 = vrot.slane %v76_v44, %v111_v41 }
  0xac   :  { %v81_v49 = vmul.f32 0.00390625, %v71_v46  ;;  %v59_v50 = vpop.xlane.xlu0 %58  ;;  %v137_v3 = vsel %vm113_vm1, %v136_v53, %v132_v58 }
  0xad   :  { %v77_v52 = vmul.f32 0.00390625, %v59_v50  ;;  %v114_v10 = vsel %vm113_vm1, %v112_v55, %v107_v62 }
  0xae   :  { %v141_v56 = vrot.slane %v81_v49, %v118_v45 }
  0xaf   :  { %v74_v57 = vpop.xlane.xlu1 %73  ;;  %v119_v59 = vrot.slane %v77_v52, %v118_v45 }
  0xb0   :  { %v82_v60 = vmul.f32 0.00390625, %v74_v57  ;;  %v62_v61 = vpop.xlane.xlu0 %61  ;;  %v142_v11 = vsel %vm120_vm2, %v141_v56, %v137_v3 }
  0xb1   :  { %v78_v63 = vmul.f32 0.00390625, %v62_v61  ;;  %v121_v17 = vsel %vm120_vm2, %v119_v59, %v114_v10 }
  0xb2   :  { %v146_v7 = vrot.slane %v82_v60, %v125_v54 }
  0xb3   :  { %v126_v16 = vrot.slane %v78_v63, %v125_v54 }
  0xb4   :  { %v147_v22 = vsel %vm127_vm3, %v146_v7, %v142_v11 }
  0xb5   :  { %v128_v23 = vsel %vm127_vm3, %v126_v16, %v121_v17 }
  0xb6   :  { %v149_v24 = vsel %vm148_vm4, %v147_v22, %v128_v23 }
  0xb7   :  { %420 = vmatmul.mubr.msk.f32.vlgmr.msra.gmra.mrb[0].mxu0 %vm150_vm5, %v149_v24 }
 0x18a   :  { %v219_v27 = vpop.f32.mrb[0].mxu0 }
 0x18b   :  { %v220_v28 = vadd.f32 %v399_v26, %v219_v27  ;;  %v421_v29 = vpop.f32.mrb[1].mxu0 }
 0x18d   :  { %v223_v30 = vmax.f32 %v220_v28, 0.0 }
 0x18f   :  { %425 = vmatmul.mubr.msk.f32.vlgmr.msra.gmra.mrb[0].mxu1 %vm232_vm6, %v223_v30 }
 0x262   :  { %v302_v32 = vpop.f32.mrb[0].mxu1 }
 0x263   :  { %v303_v33 = vadd.f32 %v401_v31, %v302_v32  ;;  %v426_v34 = vpop.f32.mrb[1].mxu1 }
 0x265   :  { %v403_v35 = vmul.f32 -1.442695, %v303_v33 }
 0x267   :  { %440 = vpow2.f32 %v403_v35 }
 0x271   :  { %v441_v36 = vpop.eup %440 }
 0x272   :  { %v309_v37 = vadd.f32 1.0, %v441_v36 }
 0x274   :  { %442 = vrcp.f32 %v309_v37 }
 0x27e   :  { %v443_v40 = vpop.eup %442 }
 0x27f   :  { %v315_v41 = vrot.slane %v443_v40, %v314_v38  ;;  %v334_v43 = vrot.slane %v443_v40, %v333_v42 }
 0x281   :  { %321 = vbcast.lane.b32.xlu1 %v315_v41, 264  ;;  %317 = vbcast.lane.b32.xlu0 %v315_v41, 256 }
 0x285   :  { %325 = vbcast.lane.b32.xlu1 %v315_v41, 272  ;;  %336 = vbcast.lane.b32.xlu0 %v334_v43, 256 }
 0x289   :  { %329 = vbcast.lane.b32.xlu1 %v315_v41, 280  ;;  %344 = vbcast.lane.b32.xlu0 %v334_v43, 272 }
 0x28d   :  { %340 = vbcast.lane.b32.xlu1 %v334_v43, 264 }
 0x291   :  { %348 = vbcast.lane.b32.xlu1 %v334_v43, 280 }
 0x2f3   :  { %v322_v44 = vpop.permute.xlu1 %321  ;;  %v318_v45 = vpop.permute.xlu0 %317 }
 0x2f4   :  { %v352_v46 = vmul.f32 %v322_v44, %v560_v8  ;;  %v353_v47 = vmul.f32 %v322_v44, %v562_v9  ;;  %v350_v48 = vmul.f32 %v318_v45, %v548_v2  ;;  %v351_v49 = vmul.f32 %v318_v45, %v552_v4 }
 0x2f6   :  { %368 = vst [vmem:[#allocation5 + $0x10] sm:$0xff] %v352_v46  ;;  %369 = vst [vmem:[#allocation5 + $0x18] sm:$0xff] %v353_v47 }
 0x2f7   :  { %366 = vst [vmem:[#allocation5] sm:$0xff] %v350_v48  ;;  %367 = vst [vmem:[#allocation5 + $0x8] sm:$0xff] %v351_v49  ;;  %v326_v39 = vpop.permute.xlu1 %325  ;;  %v337_v50 = vpop.permute.xlu0 %336 }
 0x2f8   :  { %v354_v51 = vmul.f32 %v326_v39, %v572_v14  ;;  %v355_v52 = vmul.f32 %v326_v39, %v574_v15  ;;  %v358_v53 = vmul.f32 %v337_v50, %v544_v0  ;;  %v359_v8 = vmul.f32 %v337_v50, %v546_v1 }
 0x2fa   :  { %370 = vst [vmem:[#allocation5 + $0x20] sm:$0xff] %v354_v51  ;;  %371 = vst [vmem:[#allocation5 + $0x28] sm:$0xff] %v355_v52 }
 0x2fb   :  { %374 = vst [vmem:[#allocation5 + $0x40] sm:$0xff] %v358_v53  ;;  %375 = vst [vmem:[#allocation5 + $0x48] sm:$0xff] %v359_v8  ;;  %v330_v2 = vpop.permute.xlu1 %329  ;;  %v345_v4 = vpop.permute.xlu0 %344 }
 0x2fc   :  { %v356_v9 = vmul.f32 %v330_v2, %v584_v20  ;;  %v357_v54 = vmul.f32 %v330_v2, %v586_v21  ;;  %v362_v55 = vmul.f32 %v345_v4, %v568_v12  ;;  %v363_v14 = vmul.f32 %v345_v4, %v570_v13 }
 0x2fe   :  { %372 = vst [vmem:[#allocation5 + $0x30] sm:$0xff] %v356_v9  ;;  %373 = vst [vmem:[#allocation5 + $0x38] sm:$0xff] %v357_v54 }
 0x2ff   :  { %378 = vst [vmem:[#allocation5 + $0x60] sm:$0xff] %v362_v55  ;;  %379 = vst [vmem:[#allocation5 + $0x68] sm:$0xff] %v363_v14  ;;  %v341_v0 = vpop.permute.xlu1 %340 }
 0x300   :  { %v360_v1 = vmul.f32 %v341_v0, %v554_v5  ;;  %v361_v15 = vmul.f32 %v341_v0, %v556_v6 }
 0x302   :  { %376 = vst [vmem:[#allocation5 + $0x50] sm:$0xff] %v360_v1  ;;  %377 = vst [vmem:[#allocation5 + $0x58] sm:$0xff] %v361_v15 }
 0x303   :  { %v349_v20 = vpop.permute.xlu1 %348 }
 0x304   :  { %v364_v21 = vmul.f32 %v349_v20, %v580_v18  ;;  %v365_v12 = vmul.f32 %v349_v20, %v582_v19 }
 0x306   :  { %380 = vst [vmem:[#allocation5 + $0x70] sm:$0xff] %v364_v21  ;;  %381 = vst [vmem:[#allocation5 + $0x78] sm:$0xff] %v365_v12 }
 0x307   :  { %477 = shalt.err (!%p474_p12)
}
 0x308   :  { %s478_s21 = scalar_lea.hbm %s657_s5, 2048 }
 0x309   :  { %p479_p13 = scmp.ne.s32.totalorder %s657_s5, %s478_s21  ;;  %p482_p0 = scmp.lt.u32.totalorder %s478_s21, %s657_s5 }
 0x30b   :  { %p484_p1 = pnand %p482_p0, %p479_p13 }
 0x30d   :  { %487 = shalt.err (!%p484_p1)
}
 0x30e   :  { %393 = dma.vmem_to_hbm [thread:$0]  %s388_s3, 2048, %s657_s5, [#allocation4], %s493_s28, %s493_s28, %s494_s29  }
 0x30f   :  { %490 = dma.done.wait [#allocation4], 2048  }
 0x310   :  { %491 = vsyncadd [#allocation4], 4294965248 }
 0x311   :  { %397 = vsyncpa [#allocation3], 1 }
 0x312   :  { %398 = vsyncpa [#allocation4], 1 }

</bundles_post_ra>
